<compile_context>
chip_gen: v7x
topology: tpu7x:2x2x1
jax: 0.10.0
libtpu: 0.0.40
codegen_flags: <defaults>
</compile_context>

<pallas_src>
import math

import jax
import jax.numpy as jnp
from jax import lax
from jax.experimental import pallas as pl
from jax.experimental.pallas import tpu as pltpu

EPS = 1e-5  # PyTorch BatchNorm1d default


def gc_block_kernel(x_ref, w_ref, adj_ref, st_ref, o_ref):
    """All operands are in the transposed (node-on-lanes) layout.

    x_ref  : (B, F, Np)   x^T, node dim zero-padded to Np
    w_ref  : (2, F, F)    [W1^T, W2^T]
    adj_ref: (2, Np, Np)  [adj1^T, adj2^T] zero-padded
    st_ref : (4, F, Np)   [scale1^T, shift1^T, scale2^T, shift2^T] zero-padded
    o_ref  : (B, F, Np)
    """
    B = x_ref.shape[0]

    w1 = w_ref[0]
    w2 = w_ref[1]
    a1 = adj_ref[0]
    a2 = adj_ref[1]
    s1 = st_ref[0]
    t1 = st_ref[1]
    s2 = st_ref[2]
    t2 = st_ref[3]

    # Static unroll over the (tiny) batch: each step is pure MXU pushes plus a
    # lane-dense fused multiply-add tail — no in-kernel relayouts.
    for b in range(B):
        zT = x_ref[b]                                                 # (F, Np)

        sup = jnp.dot(w1, zT, preferred_element_type=jnp.float32)    # (F, Np)
        y = jnp.dot(sup, a1, preferred_element_type=jnp.float32)     # (F, Np)
        y = jnp.maximum(y * s1 + t1, 0.0)                            # bn1 + ReLU

        sup2 = jnp.dot(w2, y, preferred_element_type=jnp.float32)
        y2 = jnp.dot(sup2, a2, preferred_element_type=jnp.float32)
        y2 = jnp.maximum(y2 * s2 + t2, 0.0)                          # bn2 + ReLU

        o_ref[b] = (y2 + zT).astype(o_ref.dtype)                     # residual


def gc_block(x, fp):
    """x: (B, N, F) float32.  fp: folded/packed params (see fold_params)."""
    B, N, F = x.shape
    Np = fp["n_pad"]

    # Wrapper-side relayout (free plumbing): node dim onto lanes + zero-pad.
    xT = jnp.transpose(x, (0, 2, 1))                        # (B, F, N)
    xT = jnp.pad(xT, ((0, 0), (0, 0), (0, Np - N)))         # (B, F, Np)

    def full(shape):
        zero_idx = (0,) * len(shape)
        return pl.BlockSpec(shape, lambda g, _z=zero_idx: _z)

    out_p = pl.pallas_call(
        gc_block_kernel,
        out_shape=jax.ShapeDtypeStruct((B, F, Np), x.dtype),
        grid=(1,),
        in_specs=[
            full((B, F, Np)),   # x^T (whole batch, one invocation)
            full((2, F, F)),    # packed weights
            full((2, Np, Np)),  # packed adjacencies
            full((4, F, Np)),   # packed scale/shift
        ],
        out_specs=full((B, F, Np)),
        compiler_params=pltpu.CompilerParams(
            dimension_semantics=("arbitrary",)
        ),
    )(xT, fp["w"], fp["adj"], fp["st"])

    # Slice padding off and restore (B, N, F).
    return jnp.transpose(out_p[:, :, :N], (0, 2, 1))


def fold_params(p, node_n, n_pad):
    """One-time fold of BN (eval) + bias into scale/shift, transpose + pad + pack."""
    N, Np = node_n, n_pad

    def fold(bias, g, be, m, v):
        scale = g * lax.rsqrt(v + EPS)            # (N, F)
        shift = be + scale * (bias[0] - m)        # bias (1,F) broadcast over nodes
        return scale, shift

    s1, t1 = fold(p["b1"], p["g1"], p["be1"], p["m1"], p["v1"])
    s2, t2 = fold(p["b2"], p["g2"], p["be2"], p["m2"], p["v2"])

    def pad_nf_T(a):   # (N, F) -> (F, Np), zero-padded nodes
        return jnp.pad(a, ((0, Np - N), (0, 0))).T

    def pad_nn_T(a):   # (N, N) adj -> (Np, Np) adj^T, zero-padded
        return jnp.pad(a, ((0, Np - N), (0, Np - N))).T

    return {
        "n_pad": Np,
        "w":   jnp.stack([p["w1"].T, p["w2"].T]),                       # (2, F, F)
        "adj": jnp.stack([pad_nn_T(p["adj1"]), pad_nn_T(p["adj2"])]),   # (2, Np, Np)
        "st":  jnp.stack([pad_nf_T(s1), pad_nf_T(t1),
                          pad_nf_T(s2), pad_nf_T(t2)]),                 # (4, F, Np)
    }


def init_params(key, node_n, in_features):
    """Mirrors GraphConvolution.reset_parameters and BatchNorm1d defaults."""
    F = in_features
    N = node_n
    stdv = 1.0 / math.sqrt(F)
    ks = jax.random.split(key, 6)
    uni = lambda k, shape: jax.random.uniform(
        k, shape, dtype=jnp.float32, minval=-stdv, maxval=stdv)

    return {
        "w1":   uni(ks[0], (F, F)),
        "adj1": uni(ks[1], (N, N)),
        "b1":   uni(ks[2], (1, F)),
        "w2":   uni(ks[3], (F, F)),
        "adj2": uni(ks[4], (N, N)),
        "b2":   uni(ks[5], (1, F)),
        # BatchNorm1d(node_n * in_features) defaults, reshaped to (N, F)
        # (flat index n*F + f -> position [n, f]).
        "g1":  jnp.ones((N, F), jnp.float32),
        "be1": jnp.zeros((N, F), jnp.float32),
        "m1":  jnp.zeros((N, F), jnp.float32),
        "v1":  jnp.ones((N, F), jnp.float32),
        "g2":  jnp.ones((N, F), jnp.float32),
        "be2": jnp.zeros((N, F), jnp.float32),
        "m2":  jnp.zeros((N, F), jnp.float32),
        "v2":  jnp.ones((N, F), jnp.float32),
    }


def gc_block_ref(x, p):
    """Pure-JAX reference using the UNFOLDED params (eval-mode BN, no dropout)."""
    def gc(inp, w, adj, b):
        return jnp.einsum("nm,bmf->bnf", adj, inp @ w) + b[0]

    def bn(y, g, be, m, v):
        return g * (y - m) * lax.rsqrt(v + EPS) + be

    y = gc(x, p["w1"], p["adj1"], p["b1"])
    y = jnp.maximum(bn(y, p["g1"], p["be1"], p["m1"], p["v1"]), 0.0)
    y = gc(y, p["w2"], p["adj2"], p["b2"])
    y = jnp.maximum(bn(y, p["g2"], p["be2"], p["m2"], p["v2"]), 0.0)
    return y + x


if __name__ == "__main__":
    B, N, F = 2, 57, 16   # batch, node_n (module default 57), in_features

    key = jax.random.PRNGKey(0)
    k_x, k_p = jax.random.split(key)
    x = jax.random.normal(k_x, (B, N, F), dtype=jnp.float32)

    raw_params = init_params(k_p, N, F)
    Np = ((N + 7) // 8) * 8   # pad node dim to the 8-row vreg granularity (57 -> 64)
    folded = fold_params(raw_params, N, Np)

    out = gc_block(x, folded)
    out = jax.block_until_ready(out)

    ref = gc_block_ref(x, raw_params)
    assert out.shape == (B, N, F)
    assert jnp.allclose(out, ref, atol=1e-4, rtol=1e-4), "mismatch vs JAX reference"

    print("KERNEL_OK")
</pallas_src>

<mosaic_0001>
module attributes {stable_mosaic.version = 11 : i64} {
  func.func @gc_block_kernel(%arg0: i32, %arg1: memref<2x16x64xf32, #tpu.memory_space<vmem>>, %arg2: memref<2x16x16xf32, #tpu.memory_space<vmem>>, %arg3: memref<2x64x64xf32, #tpu.memory_space<vmem>>, %arg4: memref<4x16x64xf32, #tpu.memory_space<vmem>>, %arg5: memref<2x16x64xf32, #tpu.memory_space<vmem>>) attributes {dimension_semantics = [#tpu.dimension_semantics<arbitrary>], iteration_bounds = array<i64: 1>, scalar_prefetch = 0 : i64, scratch_operands = 0 : i64, tpu.core_type = #tpu.core_type<tc>, window_params = [{pipeline_mode = #tpu.pipeline_mode<synchronous>, transform_indices = @transform_0, window_bounds = array<i64: 2, 16, 64>}, {pipeline_mode = #tpu.pipeline_mode<synchronous>, transform_indices = @transform_1, window_bounds = array<i64: 2, 16, 16>}, {pipeline_mode = #tpu.pipeline_mode<synchronous>, transform_indices = @transform_2, window_bounds = array<i64: 2, 64, 64>}, {pipeline_mode = #tpu.pipeline_mode<synchronous>, transform_indices = @transform_3, window_bounds = array<i64: 4, 16, 64>}, {pipeline_mode = #tpu.pipeline_mode<synchronous>, transform_indices = @transform_4, window_bounds = array<i64: 2, 16, 64>}]} {
    %c0 = arith.constant 0 : index
    %c0_0 = arith.constant 0 : index
    %c0_1 = arith.constant 0 : index
    %0 = vector.load %arg2[%c0, %c0_0, %c0_1] : memref<2x16x16xf32, #tpu.memory_space<vmem>>, vector<1x16x16xf32>
    %1 = vector.shape_cast %0 : vector<1x16x16xf32> to vector<16x16xf32>
    %c1 = arith.constant 1 : index
    %c0_2 = arith.constant 0 : index
    %c0_3 = arith.constant 0 : index
    %2 = vector.load %arg2[%c1, %c0_2, %c0_3] : memref<2x16x16xf32, #tpu.memory_space<vmem>>, vector<1x16x16xf32>
    %3 = vector.shape_cast %2 : vector<1x16x16xf32> to vector<16x16xf32>
    %c0_4 = arith.constant 0 : index
    %c0_5 = arith.constant 0 : index
    %c0_6 = arith.constant 0 : index
    %4 = vector.load %arg3[%c0_4, %c0_5, %c0_6] : memref<2x64x64xf32, #tpu.memory_space<vmem>>, vector<1x64x64xf32>
    %5 = vector.shape_cast %4 : vector<1x64x64xf32> to vector<64x64xf32>
    %c1_7 = arith.constant 1 : index
    %c0_8 = arith.constant 0 : index
    %c0_9 = arith.constant 0 : index
    %6 = vector.load %arg3[%c1_7, %c0_8, %c0_9] : memref<2x64x64xf32, #tpu.memory_space<vmem>>, vector<1x64x64xf32>
    %7 = vector.shape_cast %6 : vector<1x64x64xf32> to vector<64x64xf32>
    %c0_10 = arith.constant 0 : index
    %c0_11 = arith.constant 0 : index
    %c0_12 = arith.constant 0 : index
    %8 = vector.load %arg4[%c0_10, %c0_11, %c0_12] : memref<4x16x64xf32, #tpu.memory_space<vmem>>, vector<1x16x64xf32>
    %9 = vector.shape_cast %8 : vector<1x16x64xf32> to vector<16x64xf32>
    %c1_13 = arith.constant 1 : index
    %c0_14 = arith.constant 0 : index
    %c0_15 = arith.constant 0 : index
    %10 = vector.load %arg4[%c1_13, %c0_14, %c0_15] : memref<4x16x64xf32, #tpu.memory_space<vmem>>, vector<1x16x64xf32>
    %11 = vector.shape_cast %10 : vector<1x16x64xf32> to vector<16x64xf32>
    %c2 = arith.constant 2 : index
    %c0_16 = arith.constant 0 : index
    %c0_17 = arith.constant 0 : index
    %12 = vector.load %arg4[%c2, %c0_16, %c0_17] : memref<4x16x64xf32, #tpu.memory_space<vmem>>, vector<1x16x64xf32>
    %13 = vector.shape_cast %12 : vector<1x16x64xf32> to vector<16x64xf32>
    %c3 = arith.constant 3 : index
    %c0_18 = arith.constant 0 : index
    %c0_19 = arith.constant 0 : index
    %14 = vector.load %arg4[%c3, %c0_18, %c0_19] : memref<4x16x64xf32, #tpu.memory_space<vmem>>, vector<1x16x64xf32>
    %15 = vector.shape_cast %14 : vector<1x16x64xf32> to vector<16x64xf32>
    %c0_20 = arith.constant 0 : index
    %c0_21 = arith.constant 0 : index
    %c0_22 = arith.constant 0 : index
    %16 = vector.load %arg1[%c0_20, %c0_21, %c0_22] : memref<2x16x64xf32, #tpu.memory_space<vmem>>, vector<1x16x64xf32>
    %17 = vector.shape_cast %16 : vector<1x16x64xf32> to vector<16x64xf32>
    %cst = arith.constant dense<0.000000e+00> : vector<16x64xf32>
    %18 = tpu.matmul %1, %17, %cst {dimension_numbers = #tpu.dot_dimension_numbers<[1], [0], [0], [1], [0, 0, 1, 1], [], []>} : vector<16x16xf32>, vector<16x64xf32>, vector<16x64xf32> -> vector<16x64xf32>
    %cst_23 = arith.constant dense<0.000000e+00> : vector<16x64xf32>
    %19 = tpu.matmul %18, %5, %cst_23 {dimension_numbers = #tpu.dot_dimension_numbers<[1], [0], [0], [1], [0, 0, 1, 1], [], []>} : vector<16x64xf32>, vector<64x64xf32>, vector<16x64xf32> -> vector<16x64xf32>
    %20 = arith.mulf %19, %9 : vector<16x64xf32>
    %21 = arith.addf %20, %11 : vector<16x64xf32>
    %cst_24 = arith.constant 0.000000e+00 : f32
    %22 = vector.broadcast %cst_24 : f32 to vector<16x64xf32>
    %23 = arith.maximumf %21, %22 : vector<16x64xf32>
    %cst_25 = arith.constant dense<0.000000e+00> : vector<16x64xf32>
    %24 = tpu.matmul %3, %23, %cst_25 {dimension_numbers = #tpu.dot_dimension_numbers<[1], [0], [0], [1], [0, 0, 1, 1], [], []>} : vector<16x16xf32>, vector<16x64xf32>, vector<16x64xf32> -> vector<16x64xf32>
    %cst_26 = arith.constant dense<0.000000e+00> : vector<16x64xf32>
    %25 = tpu.matmul %24, %7, %cst_26 {dimension_numbers = #tpu.dot_dimension_numbers<[1], [0], [0], [1], [0, 0, 1, 1], [], []>} : vector<16x64xf32>, vector<64x64xf32>, vector<16x64xf32> -> vector<16x64xf32>
    %26 = arith.mulf %25, %13 : vector<16x64xf32>
    %27 = arith.addf %26, %15 : vector<16x64xf32>
    %cst_27 = arith.constant 0.000000e+00 : f32
    %28 = vector.broadcast %cst_27 : f32 to vector<16x64xf32>
    %29 = arith.maximumf %27, %28 : vector<16x64xf32>
    %30 = arith.addf %29, %17 : vector<16x64xf32>
    %c0_28 = arith.constant 0 : index
    %c0_29 = arith.constant 0 : index
    %c0_30 = arith.constant 0 : index
    %31 = vector.load %arg5[%c0_28, %c0_29, %c0_30] : memref<2x16x64xf32, #tpu.memory_space<vmem>>, vector<1x16x64xf32>
    %32 = vector.shape_cast %31 : vector<1x16x64xf32> to vector<16x64xf32>
    %33 = vector.shape_cast %30 : vector<16x64xf32> to vector<1x16x64xf32>
    tpu.vector_store %arg5[%c0_28, %c0_29, %c0_30], %33 {strides = array<i32>} : memref<2x16x64xf32, #tpu.memory_space<vmem>>, vector<1x16x64xf32>,
    %c1_31 = arith.constant 1 : index
    %c0_32 = arith.constant 0 : index
    %c0_33 = arith.constant 0 : index
    %34 = vector.load %arg1[%c1_31, %c0_32, %c0_33] : memref<2x16x64xf32, #tpu.memory_space<vmem>>, vector<1x16x64xf32>
    %35 = vector.shape_cast %34 : vector<1x16x64xf32> to vector<16x64xf32>
    %cst_34 = arith.constant dense<0.000000e+00> : vector<16x64xf32>
    %36 = tpu.matmul %1, %35, %cst_34 {dimension_numbers = #tpu.dot_dimension_numbers<[1], [0], [0], [1], [0, 0, 1, 1], [], []>} : vector<16x16xf32>, vector<16x64xf32>, vector<16x64xf32> -> vector<16x64xf32>
    %cst_35 = arith.constant dense<0.000000e+00> : vector<16x64xf32>
    %37 = tpu.matmul %36, %5, %cst_35 {dimension_numbers = #tpu.dot_dimension_numbers<[1], [0], [0], [1], [0, 0, 1, 1], [], []>} : vector<16x64xf32>, vector<64x64xf32>, vector<16x64xf32> -> vector<16x64xf32>
    %38 = arith.mulf %37, %9 : vector<16x64xf32>
    %39 = arith.addf %38, %11 : vector<16x64xf32>
    %cst_36 = arith.constant 0.000000e+00 : f32
    %40 = vector.broadcast %cst_36 : f32 to vector<16x64xf32>
    %41 = arith.maximumf %39, %40 : vector<16x64xf32>
    %cst_37 = arith.constant dense<0.000000e+00> : vector<16x64xf32>
    %42 = tpu.matmul %3, %41, %cst_37 {dimension_numbers = #tpu.dot_dimension_numbers<[1], [0], [0], [1], [0, 0, 1, 1], [], []>} : vector<16x16xf32>, vector<16x64xf32>, vector<16x64xf32> -> vector<16x64xf32>
    %cst_38 = arith.constant dense<0.000000e+00> : vector<16x64xf32>
    %43 = tpu.matmul %42, %7, %cst_38 {dimension_numbers = #tpu.dot_dimension_numbers<[1], [0], [0], [1], [0, 0, 1, 1], [], []>} : vector<16x64xf32>, vector<64x64xf32>, vector<16x64xf32> -> vector<16x64xf32>
    %44 = arith.mulf %43, %13 : vector<16x64xf32>
    %45 = arith.addf %44, %15 : vector<16x64xf32>
    %cst_39 = arith.constant 0.000000e+00 : f32
    %46 = vector.broadcast %cst_39 : f32 to vector<16x64xf32>
    %47 = arith.maximumf %45, %46 : vector<16x64xf32>
    %48 = arith.addf %47, %35 : vector<16x64xf32>
    %c1_40 = arith.constant 1 : index
    %c0_41 = arith.constant 0 : index
    %c0_42 = arith.constant 0 : index
    %49 = vector.load %arg5[%c1_40, %c0_41, %c0_42] : memref<2x16x64xf32, #tpu.memory_space<vmem>>, vector<1x16x64xf32>
    %50 = vector.shape_cast %49 : vector<1x16x64xf32> to vector<16x64xf32>
    %51 = vector.shape_cast %48 : vector<16x64xf32> to vector<1x16x64xf32>
    tpu.vector_store %arg5[%c1_40, %c0_41, %c0_42], %51 {strides = array<i32>} : memref<2x16x64xf32, #tpu.memory_space<vmem>>, vector<1x16x64xf32>,
    return
  }
  func.func @transform_0(%arg0: i32) -> (i32, i32, i32) {
    %c0_i32 = arith.constant 0 : i32
    %c0_i32_0 = arith.constant 0 : i32
    %c0_i32_1 = arith.constant 0 : i32
    %c0_i32_2 = arith.constant 0 : i32
    return %c0_i32, %c0_i32_0, %c0_i32_1 : i32, i32, i32
  }
  func.func @transform_1(%arg0: i32) -> (i32, i32, i32) {
    %c0_i32 = arith.constant 0 : i32
    %c0_i32_0 = arith.constant 0 : i32
    %c0_i32_1 = arith.constant 0 : i32
    %c0_i32_2 = arith.constant 0 : i32
    return %c0_i32, %c0_i32_0, %c0_i32_1 : i32, i32, i32
  }
  func.func @transform_2(%arg0: i32) -> (i32, i32, i32) {
    %c0_i32 = arith.constant 0 : i32
    %c0_i32_0 = arith.constant 0 : i32
    %c0_i32_1 = arith.constant 0 : i32
    %c0_i32_2 = arith.constant 0 : i32
    return %c0_i32, %c0_i32_0, %c0_i32_1 : i32, i32, i32
  }
  func.func @transform_3(%arg0: i32) -> (i32, i32, i32) {
    %c0_i32 = arith.constant 0 : i32
    %c0_i32_0 = arith.constant 0 : i32
    %c0_i32_1 = arith.constant 0 : i32
    %c0_i32_2 = arith.constant 0 : i32
    return %c0_i32, %c0_i32_0, %c0_i32_1 : i32, i32, i32
  }
  func.func @transform_4(%arg0: i32) -> (i32, i32, i32) {
    %c0_i32 = arith.constant 0 : i32
    %c0_i32_0 = arith.constant 0 : i32
    %c0_i32_1 = arith.constant 0 : i32
    %c0_i32_2 = arith.constant 0 : i32
    return %c0_i32, %c0_i32_0, %c0_i32_1 : i32, i32, i32
  }
}

</mosaic_0001>

<bundles_post_ra>
// kernel: tpu_custom_call.1
= control target key start
LH: loop header
LB: loop body
LE: loop exit
PB: predicated region body
PF: predicated region fallthrough
CT: control target
= control target key end

     0   :  { %9 = vsyncpa [#allocation3], 0  ;;  %s1339_s0 = inlined_call_operand.hbm [shape: f32[2,16,64], index: 0, kind: input, shape index: {}]   ;;  %s1340_s1 = inlined_call_operand.hbm [shape: f32[2,16,16], index: 1, kind: input, shape index: {}]   ;;  %s1341_s2 = inlined_call_operand.hbm [shape: f32[2,64,64], index: 2, kind: input, shape index: {}]   ;;  %s1342_s3 = inlined_call_operand.hbm [shape: f32[4,16,64], index: 3, kind: input, shape index: {}]   ;;  %s1343_s4 = inlined_call_operand.hbm [shape: f32[2,16,64], index: 4, kind: output, shape index: {}]  }
   0x1   :  { %10 = vsyncpa [#allocation6], 0 }
   0x2   :  { %11 = vsyncpa [#allocation9], 0 }
   0x3   :  { %12 = vsyncpa [#allocation4], 0  ;;  %s1182_s15 = smov [#allocation5]   ;;  %s1183_s17 = smov [#allocation2]  }
   0x4   :  { %s30_s16 = sshll.u32 %s1182_s15, 4  ;;  %s18_s18 = sshll.u32 %s1183_s17, 4  ;;  %s31_s16 = int_to_ptr.vmem [resolvable:$true] %s30_s16  ;;  %s1214_s18 = int_to_ptr.vmem [resolvable:$true] %s18_s18 }
   0x5   :  { %s1064_s21 = scalar_lea.hbm %s1340_s1, 512 }
   0x6   :  { %p1065_p0 = scmp.ne.s32.totalorder %s1340_s1, %s1064_s21  ;;  %p1068_p1 = scmp.lt.u32.totalorder %s1064_s21, %s1340_s1 }
   0x8   :  { %p1070_p2 = pnand %p1068_p1, %p1065_p0 }
   0xa   :  { %1073 = shalt.err (!%p1070_p2)
}
   0xb   :  { %s1074_s26 = scalar_lea.vmem %s31_s16, 512  ;;  %p1079_p4 = scmp.lt.s32.totalorder %s31_s16, %s31_s16 }
   0xc   :  { %p1075_p3 = scmp.ne.s32.totalorder %s31_s16, %s1074_s26  ;;  %p1080_p5 = scmp.lt.s32.totalorder %s1074_s26, %s1074_s26 }
   0xe   :  { %p1081_p6 = por %p1080_p5, %p1079_p4 }
  0x10   :  { %p1082_p7 = pnand %p1081_p6, %p1075_p3 }
  0x12   :  { %1085 = shalt.err (!%p1082_p7)
}
  0x13   :  { %s1184_s27 = smov 128   ;;  %s1185_s28 = smov 8  }
  0x14   :  { %36 = dma.hbm_to_vmem [thread:$0]  %s1340_s1, 512, %s31_s16, [#allocation6], %s1184_s27, %s1184_s27, %s1185_s28  }
  0x15   :  { %s1086_s7 = scalar_lea.hbm %s1339_s0, 512 }
  0x16   :  { %p1087_p8 = scmp.ne.s32.totalorder %s1339_s0, %s1086_s7  ;;  %p1090_p9 = scmp.lt.u32.totalorder %s1086_s7, %s1339_s0 }
  0x18   :  { %p1092_p10 = pnand %p1090_p9, %p1087_p8 }
  0x1a   :  { %1095 = shalt.err (!%p1092_p10)
}
  0x1b   :  { %s1096_s12 = scalar_lea.vmem %s1214_s18, 512  ;;  %p1101_p12 = scmp.lt.s32.totalorder %s1214_s18, %s1214_s18 }
  0x1c   :  { %p1097_p11 = scmp.ne.s32.totalorder %s1214_s18, %s1096_s12  ;;  %p1102_p13 = scmp.lt.s32.totalorder %s1096_s12, %s1096_s12 }
  0x1e   :  { %p1103_p0 = por %p1102_p13, %p1101_p12 }
  0x20   :  { %p1104_p1 = pnand %p1103_p0, %p1097_p11 }
  0x22   :  { %1107 = shalt.err (!%p1104_p1)
}
  0x23   :  { %24 = dma.hbm_to_vmem [thread:$0]  %s1339_s0, 512, %s1214_s18, [#allocation3], %s1184_s27, %s1184_s27, %s1185_s28  }
  0x24   :  { %s1186_s14 = smov [#allocation7]   ;;  %s1187_s16 = smov [#allocation8]  }
  0x25   :  { %s42_s15 = sshll.u32 %s1186_s14, 4  ;;  %s54_s17 = sshll.u32 %s1187_s16, 4  ;;  %s43_s15 = int_to_ptr.vmem [resolvable:$true] %s42_s15  ;;  %s1251_s17 = int_to_ptr.vmem [resolvable:$true] %s54_s17 }
  0x26   :  { %s1108_s21 = scalar_lea.hbm %s1341_s2, 2048 }
  0x27   :  { %p1109_p2 = scmp.ne.s32.totalorder %s1341_s2, %s1108_s21  ;;  %p1112_p3 = scmp.lt.u32.totalorder %s1108_s21, %s1341_s2 }
  0x29   :  { %p1114_p4 = pnand %p1112_p3, %p1109_p2 }
  0x2b   :  { %1117 = shalt.err (!%p1114_p4)
}
  0x2c   :  { %s1118_s0 = scalar_lea.vmem %s43_s15, 2048  ;;  %p1123_p6 = scmp.lt.s32.totalorder %s43_s15, %s43_s15 }
  0x2d   :  { %p1119_p5 = scmp.ne.s32.totalorder %s43_s15, %s1118_s0  ;;  %p1124_p7 = scmp.lt.s32.totalorder %s1118_s0, %s1118_s0 }
  0x2f   :  { %p1125_p8 = por %p1124_p7, %p1123_p6 }
  0x31   :  { %p1126_p9 = pnand %p1125_p8, %p1119_p5 }
  0x33   :  { %1129 = shalt.err (!%p1126_p9)
}
  0x34   :  { %48 = dma.hbm_to_vmem [thread:$0]  %s1341_s2, 2048, %s43_s15, [#allocation6], %s1184_s27, %s1184_s27, %s1185_s28  }
  0x35   :  { %s1130_s5 = scalar_lea.hbm %s1342_s3, 1024 }
  0x36   :  { %p1131_p10 = scmp.ne.s32.totalorder %s1342_s3, %s1130_s5  ;;  %p1134_p11 = scmp.lt.u32.totalorder %s1130_s5, %s1342_s3 }
  0x38   :  { %p1136_p12 = pnand %p1134_p11, %p1131_p10 }
  0x3a   :  { %1139 = shalt.err (!%p1136_p12)
}
  0x3b   :  { %s1140_s10 = scalar_lea.vmem %s1251_s17, 1024  ;;  %p1145_p0 = scmp.lt.s32.totalorder %s1251_s17, %s1251_s17 }
  0x3c   :  { %p1141_p13 = scmp.ne.s32.totalorder %s1251_s17, %s1140_s10  ;;  %p1146_p1 = scmp.lt.s32.totalorder %s1140_s10, %s1140_s10 }
  0x3e   :  { %p1147_p2 = por %p1146_p1, %p1145_p0 }
  0x40   :  { %p1148_p3 = pnand %p1147_p2, %p1141_p13 }
  0x42   :  { %1151 = shalt.err (!%p1148_p3)
}
  0x43   :  { %60 = dma.hbm_to_vmem [thread:$0]  %s1342_s3, 1024, %s1251_s17, [#allocation9], %s1184_s27, %s1184_s27, %s1185_s28  }
  0x44   :  { %1174 = dma.done.wait [#allocation3], 512  }
  0x45   :  { %1175 = vsyncadd [#allocation3], 4294966784 }
  0x46   :  { %1176 = dma.done.wait [#allocation6], 2560  }
  0x47   :  { %1177 = vsyncadd [#allocation6], 4294964736 }
  0x48   :  { %1178 = dma.done.wait [#allocation9], 1024  }
  0x49   :  { %1179 = vsyncadd [#allocation9], 4294966272  ;;  %vm108_vm0 = vcmask 130048   ;;  %v1288_v0 = vld [vmem:[#allocation2] sm:$0xff]  ;;  %v1290_v1 = vld [vmem:[#allocation2 + $0x8] sm:$0xff]  ;;  %vm190_vm1 = vcmask 523264  }
  0x4a   :  { %v73_v2 = vld [vmem:[#allocation5] sm:$0xff]  ;;  %v977_v3 = vpack.c.bf16 %v1290_v1, %v1288_v0  ;;  %v79_v5 = vld [vmem:[#allocation7 + $0x8] sm:$0xff]  ;;  %v80_v7 = vld [vmem:[#allocation7 + $0x10] sm:$0xff]  ;;  %s1188_s3 = smov [#allocation10]  }
  0x4b   :  { %877 = vmatprep.mubr.msk.f32.mxu1 %vm108_vm0, %v73_v2  ;;  %v78_v4 = vld [vmem:[#allocation7] sm:$0xff]  ;;  %v81_v8 = vld [vmem:[#allocation7 + $0x18] sm:$0xff]  ;;  %v74_v9 = vld [vmem:[#allocation5 + $0x8] sm:$0xff]  ;;  %s787_s12 = sshll.u32 %s1188_s3, 4  ;;  %s788_s12 = int_to_ptr.vmem [resolvable:$true] %s787_s12 }
  0x4c   :  { %v981_v6 = vpack.c.bf16 %v79_v5, %v78_v4  ;;  %978 = vmatprep.subr.bf16.mxu1 %v977_v3  ;;  %v985_v10 = vpack.c.bf16 %v81_v8, %v80_v7  ;;  %v82_v11 = vld [vmem:[#allocation7 + $0x20] sm:$0xff]  ;;  %v83_v12 = vld [vmem:[#allocation7 + $0x28] sm:$0xff]  ;;  %v84_v14 = vld [vmem:[#allocation7 + $0x30] sm:$0xff]  ;;  %s1152_s1 = scalar_lea.vmem %s788_s12, 512  ;;  %p1157_p5 = scmp.lt.s32.totalorder %s788_s12, %s788_s12 }
  0x4d   :  { %980 = vmatpush3.bf16.msra.mxu1 %v977_v3  ;;  %v989_v13 = vpack.c.bf16 %v83_v12, %v82_v11  ;;  %v85_v15 = vld [vmem:[#allocation7 + $0x38] sm:$0xff]  ;;  %v1296_v17 = vld [vmem:[#allocation2 + $0x10] sm:$0xff]  ;;  %v96_v23 = vld [vmem:[#allocation8 + $0x8] sm:$0xff]  ;;  %p1153_p4 = scmp.ne.s32.totalorder %s788_s12, %s1152_s1  ;;  %p1158_p6 = scmp.lt.s32.totalorder %s1152_s1, %s1152_s1 }
  0x4e   :  { %982 = vmatprep.subr.bf16.mxu1 %v981_v6  ;;  %v993_v16 = vpack.c.bf16 %v85_v15, %v84_v14  ;;  %v1298_v18 = vld [vmem:[#allocation2 + $0x18] sm:$0xff]  ;;  %v76_v22 = vld [vmem:[#allocation5 + $0x10] sm:$0xff]  ;;  %v95_v24 = vld [vmem:[#allocation8] sm:$0xff] }
  0x4f   :  { %v1017_v19 = vpack.c.bf16 %v1298_v18, %v1296_v17  ;;  %903 = vmatprep.mubr.msk.f32.mxu0 %vm108_vm0, %v76_v22  ;;  %v99_v25 = vld [vmem:[#allocation8 + $0x18] sm:$0xff]  ;;  %v98_v28 = vld [vmem:[#allocation8 + $0x10] sm:$0xff]  ;;  %v87_v36 = vld [vmem:[#allocation7 + $0x40] sm:$0xff]  ;;  %p1159_p7 = por %p1158_p6, %p1157_p5 }
  0x50   :  { %878 = vmatmul.mubr.msk.f32.vlgmr.msra.gmra.mrb[0].mxu1 %vm108_vm0, %v74_v9  ;;  %v88_v37 = vld [vmem:[#allocation7 + $0x48] sm:$0xff]  ;;  %v89_v41 = vld [vmem:[#allocation7 + $0x50] sm:$0xff]  ;;  %v90_v42 = vld [vmem:[#allocation7 + $0x58] sm:$0xff] }
  0x51   :  { %984 = vmatpush3.bf16.msra.mxu1 %v981_v6  ;;  %v1001_v40 = vpack.c.bf16 %v88_v37, %v87_v36  ;;  %v77_v43 = vld [vmem:[#allocation5 + $0x18] sm:$0xff]  ;;  %v1005_v44 = vpack.c.bf16 %v90_v42, %v89_v41  ;;  %v91_v45 = vld [vmem:[#allocation7 + $0x60] sm:$0xff]  ;;  %v92_v46 = vld [vmem:[#allocation7 + $0x68] sm:$0xff]  ;;  %p1160_p8 = pnand %p1159_p7, %p1153_p4 }
  0x52   :  { %986 = vmatprep.subr.bf16.mxu1 %v985_v10  ;;  %v1009_v47 = vpack.c.bf16 %v92_v46, %v91_v45  ;;  %v93_v48 = vld [vmem:[#allocation7 + $0x70] sm:$0xff]  ;;  %v94_v49 = vld [vmem:[#allocation7 + $0x78] sm:$0xff]  ;;  %v102_v62 = vld [vmem:[#allocation8 + $0x28] sm:$0xff] }
  0x53   :  { %v1013_v50 = vpack.c.bf16 %v94_v49, %v93_v48  ;;  %v101_v63 = vld [vmem:[#allocation8 + $0x20] sm:$0xff]  ;;  %v104_v5 = vld [vmem:[#allocation8 + $0x30] sm:$0xff] }
  0x55   :  { %988 = vmatpush3.bf16.msra.mxu1 %v985_v10 }
  0x56   :  { %990 = vmatprep.subr.bf16.mxu1 %v989_v13 }
  0x59   :  { %992 = vmatpush3.bf16.msra.mxu1 %v989_v13 }
  0x5a   :  { %994 = vmatprep.subr.bf16.mxu1 %v993_v16 }
  0x5d   :  { %996 = vmatpush3.bf16.msra.mxu1 %v993_v16 }
  0x5e   :  { %1018 = vmatprep.subr.bf16.mxu1 %v1017_v19 }
 0x123   :  { %v879_v20 = vpop.f32.mrb[0].mxu1 }
 0x124   :  { %v181_v21 = vpop.f32.mrb[1].mxu1 }
 0x125   :  { %896 = vmatprep.mubr.msk.f32.mxu1 %vm190_vm1, %v181_v21 }
 0x126   :  { %897 = vmatmul.mubr.msk.f32.vlgmr.msra.gmra.mrb[2].mxu1 %vm190_vm1, %v879_v20 }
 0x127   :  { %1020 = vmatpush3.bf16.msra.mxu1 %v1017_v19  ;;  %929 = vmatprep.mubr.msk.f32.mxu1 %vm108_vm0, %v73_v2  ;;  %v105_v2 = vld [vmem:[#allocation8 + $0x38] sm:$0xff] }
 0x128   :  { %1022 = vmatprep.subr.bf16.mxu1 %v981_v6 }
 0x12a   :  { %930 = vmatmul.mubr.msk.f32.vlgmr.msra.gmra.mrb[4].mxu1 %vm108_vm0, %v74_v9 }
 0x12b   :  { %1024 = vmatpush3.bf16.msra.mxu1 %v981_v6 }
 0x12c   :  { %1026 = vmatprep.subr.bf16.mxu1 %v985_v10 }
 0x12f   :  { %1028 = vmatpush3.bf16.msra.mxu1 %v985_v10 }
 0x130   :  { %1030 = vmatprep.subr.bf16.mxu1 %v989_v13 }
 0x133   :  { %1032 = vmatpush3.bf16.msra.mxu1 %v989_v13 }
 0x134   :  { %1034 = vmatprep.subr.bf16.mxu1 %v993_v16 }
 0x137   :  { %1036 = vmatpush3.bf16.msra.mxu1 %v993_v16 }
 0x1f9   :  { %v898_v26 = vpop.f32.mrb[2].mxu1 }
 0x1fa   :  { %v273_v27 = vmul.f32 %v898_v26, %v96_v23  ;;  %v263_v29 = vpop.f32.mrb[3].mxu1 }
 0x1fb   :  { %v272_v30 = vmul.f32 %v263_v29, %v95_v24 }
 0x1fc   :  { %v275_v31 = vadd.f32 %v273_v27, %v99_v25 }
 0x1fd   :  { %v274_v32 = vadd.f32 %v272_v30, %v98_v28  ;;  %v931_v33 = vpop.f32.mrb[4].mxu1 }
 0x1fe   :  { %v277_v34 = vmax.f32 %v275_v31, 0.0  ;;  %v519_v35 = vpop.f32.mrb[5].mxu1 }
 0x1ff   :  { %v276_v38 = vmax.f32 %v274_v32, 0.0  ;;  %948 = vmatprep.mubr.msk.f32.mxu1 %vm190_vm1, %v519_v35 }
 0x200   :  { %949 = vmatmul.mubr.msk.f32.vlgmr.msra.gmra.mrb[6].mxu1 %vm190_vm1, %v931_v33 }
 0x201   :  { %v997_v39 = vpack.c.bf16 %v277_v34, %v276_v38 }
 0x203   :  { %998 = vmatprep.subr.bf16.mxu0 %v997_v39 }
 0x204   :  { %1000 = vmatpush3.bf16.msra.mxu0 %v997_v39 }
 0x205   :  { %1002 = vmatprep.subr.bf16.mxu0 %v1001_v40 }
 0x207   :  { %904 = vmatmul.mubr.msk.f32.vlgmr.msra.gmra.mrb[0].mxu0 %vm108_vm0, %v77_v43 }
 0x208   :  { %1004 = vmatpush3.bf16.msra.mxu0 %v1001_v40 }
 0x209   :  { %1006 = vmatprep.subr.bf16.mxu0 %v1005_v44 }
 0x20c   :  { %1008 = vmatpush3.bf16.msra.mxu0 %v1005_v44 }
 0x20d   :  { %1010 = vmatprep.subr.bf16.mxu0 %v1009_v47 }
 0x210   :  { %1012 = vmatpush3.bf16.msra.mxu0 %v1009_v47 }
 0x211   :  { %1014 = vmatprep.subr.bf16.mxu0 %v1013_v50 }
 0x214   :  { %1016 = vmatpush3.bf16.msra.mxu0 %v1013_v50 }
 0x2d3   :  { %v950_v51 = vpop.f32.mrb[6].mxu1 }
 0x2d4   :  { %v610_v52 = vmul.f32 %v950_v51, %v96_v23  ;;  %v600_v53 = vpop.f32.mrb[7].mxu1 }
 0x2d5   :  { %v609_v54 = vmul.f32 %v600_v53, %v95_v24 }
 0x2d6   :  { %v612_v55 = vadd.f32 %v610_v52, %v99_v25 }
 0x2d7   :  { %v611_v56 = vadd.f32 %v609_v54, %v98_v28 }
 0x2d8   :  { %v614_v57 = vmax.f32 %v612_v55, 0.0 }
 0x2d9   :  { %v613_v58 = vmax.f32 %v611_v56, 0.0 }
 0x2da   :  { %v905_v59 = vpop.f32.mrb[0].mxu0 }
 0x2db   :  { %v350_v60 = vpop.f32.mrb[1].mxu0  ;;  %v1037_v61 = vpack.c.bf16 %v614_v57, %v613_v58 }
 0x2dc   :  { %922 = vmatprep.mubr.msk.f32.mxu0 %vm190_vm1, %v350_v60 }
 0x2dd   :  { %923 = vmatmul.mubr.msk.f32.vlgmr.msra.gmra.mrb[2].mxu0 %vm190_vm1, %v905_v59  ;;  %1038 = vmatprep.subr.bf16.mxu0 %v1037_v61 }
 0x2de   :  { %1040 = vmatpush3.bf16.msra.mxu0 %v1037_v61  ;;  %955 = vmatprep.mubr.msk.f32.mxu0 %vm108_vm0, %v76_v22 }
 0x2df   :  { %1042 = vmatprep.subr.bf16.mxu0 %v1001_v40 }
 0x2e1   :  { %956 = vmatmul.mubr.msk.f32.vlgmr.msra.gmra.mrb[4].mxu0 %vm108_vm0, %v77_v43 }
 0x2e2   :  { %1044 = vmatpush3.bf16.msra.mxu0 %v1001_v40 }
 0x2e3   :  { %1046 = vmatprep.subr.bf16.mxu0 %v1005_v44 }
 0x2e6   :  { %1048 = vmatpush3.bf16.msra.mxu0 %v1005_v44 }
 0x2e7   :  { %1050 = vmatprep.subr.bf16.mxu0 %v1009_v47 }
 0x2ea   :  { %1052 = vmatpush3.bf16.msra.mxu0 %v1009_v47 }
 0x2eb   :  { %1054 = vmatprep.subr.bf16.mxu0 %v1013_v50 }
 0x2ee   :  { %1056 = vmatpush3.bf16.msra.mxu0 %v1013_v50 }
 0x3b0   :  { %v924_v3 = vpop.f32.mrb[2].mxu0 }
 0x3b1   :  { %v441_v4 = vmul.f32 %v924_v3, %v102_v62  ;;  %v431_v6 = vpop.f32.mrb[3].mxu0 }
 0x3b2   :  { %v440_v7 = vmul.f32 %v431_v6, %v101_v63 }
 0x3b3   :  { %v443_v8 = vadd.f32 %v441_v4, %v105_v2 }
 0x3b4   :  { %v442_v9 = vadd.f32 %v440_v7, %v104_v5  ;;  %v957_v10 = vpop.f32.mrb[4].mxu0 }
 0x3b5   :  { %v445_v11 = vmax.f32 %v443_v8, 0.0  ;;  %v681_v12 = vpop.f32.mrb[5].mxu0 }
 0x3b6   :  { %v444_v13 = vmax.f32 %v442_v9, 0.0  ;;  %974 = vmatprep.mubr.msk.f32.mxu0 %vm190_vm1, %v681_v12 }
 0x3b7   :  { %v447_v14 = vadd.f32 %v445_v11, %v1290_v1  ;;  %975 = vmatmul.mubr.msk.f32.vlgmr.msra.gmra.mrb[6].mxu0 %vm190_vm1, %v957_v10 }
 0x3b8   :  { %v446_v15 = vadd.f32 %v444_v13, %v1288_v0 }
 0x3b9   :  { %449 = vst.msk [vmem:[#allocation10 + $0x8] sm:$0xff] %vm190_vm1, %v447_v14 }
 0x3ba   :  { %448 = vst.msk [vmem:[#allocation10] sm:$0xff] %vm190_vm1, %v446_v15 }
 0x48a   :  { %v976_v16 = vpop.f32.mrb[6].mxu0 }
 0x48b   :  { %v772_v19 = vmul.f32 %v976_v16, %v102_v62  ;;  %v762_v20 = vpop.f32.mrb[7].mxu0 }
 0x48c   :  { %v771_v21 = vmul.f32 %v762_v20, %v101_v63 }
 0x48d   :  { %v774_v22 = vadd.f32 %v772_v19, %v105_v2 }
 0x48e   :  { %v773_v23 = vadd.f32 %v771_v21, %v104_v5 }
 0x48f   :  { %v776_v24 = vmax.f32 %v774_v22, 0.0 }
 0x490   :  { %v775_v25 = vmax.f32 %v773_v23, 0.0 }
 0x491   :  { %v778_v1 = vadd.f32 %v776_v24, %v1298_v18 }
 0x492   :  { %v777_v26 = vadd.f32 %v775_v25, %v1296_v17 }
 0x493   :  { %781 = vst.msk [vmem:[#allocation10 + $0x18] sm:$0xff] %vm190_vm1, %v778_v1 }
 0x494   :  { %780 = vst.msk [vmem:[#allocation10 + $0x10] sm:$0xff] %vm190_vm1, %v777_v26 }
 0x495   :  { %1163 = shalt.err (!%p1160_p8)
}
 0x496   :  { %s1164_s15 = scalar_lea.hbm %s1343_s4, 512 }
 0x497   :  { %p1165_p9 = scmp.ne.s32.totalorder %s1343_s4, %s1164_s15  ;;  %p1168_p10 = scmp.lt.u32.totalorder %s1164_s15, %s1343_s4 }
 0x499   :  { %p1170_p11 = pnand %p1168_p10, %p1165_p9 }
 0x49b   :  { %1173 = shalt.err (!%p1170_p11)
}
 0x49c   :  { %793 = dma.vmem_to_hbm [thread:$0]  %s788_s12, 512, %s1343_s4, [#allocation4], %s1184_s27, %s1184_s27, %s1185_s28  }
 0x49d   :  { %1180 = dma.done.wait [#allocation4], 512  }
 0x49e   :  { %1181 = vsyncadd [#allocation4], 4294966784 }
 0x49f   :  { %797 = vsyncpa [#allocation3], 1 }
 0x4a0   :  { %798 = vsyncpa [#allocation6], 1 }
 0x4a1   :  { %799 = vsyncpa [#allocation9], 1 }
 0x4a2   :  { %800 = vsyncpa [#allocation4], 1 }

</bundles_post_ra>
